<compile_context>
chip_gen: v5e
topology: v5e:2x2
jax: 0.10.0
libtpu: 0.0.40
codegen_flags: <defaults>
</compile_context>

<pallas_src>
import math

import jax
import jax.numpy as jnp
from jax.experimental import pallas as pl
from jax.experimental.pallas import tpu as pltpu

_NORM_EPS = 1e-12  # torch.nn.functional.normalize default eps


def _round_up(v, m):
    return ((v + m - 1) // m) * m


def _cdiv(a, b):
    return -(-a // b)


def _vmem_limit_bytes():
    # ~75% of physical VMEM per core: v5e/v6e 128 MiB -> 96 MiB, v7x 64 MiB -> 48 MiB.
    try:
        cap = int(pltpu.get_tpu_info().vmem_capacity_bytes)
    except Exception:
        cap = 64 * 1024 * 1024  # conservative default
    return int(cap * 3 // 4)


def _make_kernel(transpose, scale_output, k_tiled):
    """Kernel factory.

    transpose    : contract the last dims of both operands (x @ w.T) on the MXU.
    scale_output : multiply the finished f32 output tile by a lane-dense (1, TN) scale
                   (fused F.normalize for transpose=True).
    k_tiled      : third (reduction) grid axis with an f32 VMEM accumulator.
    """

    def contract(x, w):
        if transpose:
            return jax.lax.dot_general(
                x, w, dimension_numbers=(((1,), (1,)), ((), ())),
                preferred_element_type=jnp.float32)
        return jnp.dot(x, w, preferred_element_type=jnp.float32)

    if not k_tiled:
        if scale_output:
            def kernel(x_ref, w_ref, inv_ref, o_ref):
                acc = contract(x_ref[...], w_ref[...])
                o_ref[...] = (acc * inv_ref[...]).astype(o_ref.dtype)
        else:
            def kernel(x_ref, w_ref, o_ref):
                o_ref[...] = contract(x_ref[...], w_ref[...]).astype(o_ref.dtype)
        return kernel

    if scale_output:
        def kernel(x_ref, w_ref, inv_ref, o_ref, acc_ref):
            @pl.when(pl.program_id(2) == 0)
            def _():
                acc_ref[...] = jnp.zeros_like(acc_ref)

            acc_ref[...] += contract(x_ref[...], w_ref[...])

            @pl.when(pl.program_id(2) == pl.num_programs(2) - 1)
            def _():
                o_ref[...] = (acc_ref[...] * inv_ref[...]).astype(o_ref.dtype)
    else:
        def kernel(x_ref, w_ref, o_ref, acc_ref):
            @pl.when(pl.program_id(2) == 0)
            def _():
                acc_ref[...] = jnp.zeros_like(acc_ref)

            acc_ref[...] += contract(x_ref[...], w_ref[...])

            @pl.when(pl.program_id(2) == pl.num_programs(2) - 1)
            def _():
                o_ref[...] = acc_ref[...].astype(o_ref.dtype)
    return kernel


def matrix_multiply(x, tensor, *, transpose=False, normalize=False,
                    max_tile_rows=2048, force_k_tile=None):
    """Pallas TPU equivalent of MatrixMultiply.forward."""
    *lead, K = x.shape
    if transpose:
        N, Kw = tensor.shape
    else:
        Kw, N = tensor.shape
    assert K == Kw, f"contracting dim mismatch: {K} vs {Kw}"

    M = 1
    for d in lead:
        M *= int(d)

    out_dtype = jnp.result_type(x.dtype, tensor.dtype)
    xb = jnp.dtype(x.dtype).itemsize
    wb = jnp.dtype(tensor.dtype).itemsize
    ob = jnp.dtype(out_dtype).itemsize

    scale_output = bool(normalize and transpose)

    # ---- F.normalize(tensor, dim=-1) fusion -------------------------------------
    w = tensor
    inv_row = None
    if normalize:
        wf = tensor.astype(jnp.float32)
        norm = jnp.sqrt(jnp.sum(wf * wf, axis=-1, keepdims=True))
        if transpose:
            # dim=-1 is the contracting dim of `tensor` => one scale per OUTPUT column.
            # Apply it to the finished output tile in-kernel; pass as lane-dense (1, N).
            inv_row = (1.0 / jnp.maximum(norm, _NORM_EPS)).reshape(1, N)
        else:
            # dim=-1 is the output dim => scale is per contracting index.  Fold it into
            # the weight once (single K*N pass); the kernel stays a plain matmul.
            w = (wf / jnp.maximum(norm, _NORM_EPS)).astype(tensor.dtype)

    # ---- tile sizing --------------------------------------------------------------
    vmem_limit = _vmem_limit_bytes()
    budget = int(vmem_limit * 0.9)

    M8 = _round_up(max(M, 1), 8)
    N128 = _round_up(N, 128)
    K128 = _round_up(K, 128)

    def est(tr, tn, tk, ktiled):
        b = 2 * (tr * tk * xb + tk * tn * wb + tr * tn * ob)   # double-buffered tiles
        if scale_output:
            b += 2 * 8 * tn * 4                                # (1, tn) f32, sublane-padded
        if ktiled:
            b += tr * tn * 4                                   # f32 accumulator scratch
        return b

    TN = min(256, N128)
    TR = min(_round_up(max_tile_rows, 8), M8)
    TK = K
    k_tiled = False

    # Over budget: shrink TN first (the x tile is resident across the inner column axis,
    # so a narrower TN costs no extra HBM traffic), only then TR (shrinking TR multiplies
    # weight re-reads).
    while est(TR, TN, K, False) > budget:
        if TN > 128:
            TN = max(128, TN // 2)
        elif TR > 8:
            TR = max(8, _round_up(TR // 2, 8))
        else:
            break

    # If even MXU-native 256x256 output tiles with full-K-resident operands do not fit
    # (v7x 64 MiB VMEM, large K / f32), tile K instead of shrinking TR/TN.
    TR_native = min(256, M8)
    TN_native = min(256, N128)
    if (K > 512
            and est(TR_native, TN_native, K, False) > budget
            and est(TR_native, TN_native, 128, True) <= budget):
        k_tiled = True
        TR, TN, TK = TR_native, TN_native, 128
        while TK * 2 <= K128 and est(TR, TN, TK * 2, True) <= budget:
            TK *= 2

    if force_k_tile is not None:  # testing hook for the reduction-axis path
        k_tiled = True
        TK = min(_round_up(int(force_k_tile), 128), K128)

    # Balance row tiles so Mp - M padding waste is bounded by < 8 rows.
    n_row_tiles = _cdiv(M, TR)
    TR = min(TR, _round_up(_cdiv(M, n_row_tiles), 8))

    Mp = _round_up(M, TR)
    Np = _round_up(N, TN)
    Kp = _round_up(K, TK) if k_tiled else K

    # ---- zero-pad operands (padding never changes the slice we keep) --------------
    x2 = x.reshape(M, K)
    if Mp != M or Kp != K:
        x2 = jnp.pad(x2, ((0, Mp - M), (0, Kp - K)))
    if transpose:
        if Np != N or Kp != K:
            w = jnp.pad(w, ((0, Np - N), (0, Kp - K)))
    else:
        if Kp != K or Np != N:
            w = jnp.pad(w, ((0, Kp - K), (0, Np - N)))
    if scale_output and Np != N:
        inv_row = jnp.pad(inv_row, ((0, 0), (0, Np - N)))

    n_row_tiles = Mp // TR
    n_col_tiles = Np // TN

    # Grid-axis order: keep the operand whose re-streaming would cost more HBM traffic
    # resident across the inner axis.
    if k_tiled:
        rows_first = True
    else:
        x_bytes = Mp * Kp * xb
        w_bytes = Kp * Np * wb
        rows_first = (x_bytes + n_row_tiles * w_bytes
                      <= w_bytes + n_col_tiles * x_bytes)

    if rows_first:
        grid = (n_row_tiles, n_col_tiles)
        gi = lambda *idx: idx[0]
        gj = lambda *idx: idx[1]
    else:
        grid = (n_col_tiles, n_row_tiles)
        gi = lambda *idx: idx[1]
        gj = lambda *idx: idx[0]
    if k_tiled:
        grid = grid + (Kp // TK,)
        gk = lambda *idx: idx[2]
    else:
        gk = lambda *idx: 0

    kx = TK if k_tiled else K
    x_spec = pl.BlockSpec((TR, kx), lambda *idx: (gi(*idx), gk(*idx)))
    if transpose:
        w_spec = pl.BlockSpec((TN, kx), lambda *idx: (gj(*idx), gk(*idx)))
    else:
        w_spec = pl.BlockSpec((kx, TN), lambda *idx: (gk(*idx), gj(*idx)))
    out_spec = pl.BlockSpec((TR, TN), lambda *idx: (gi(*idx), gj(*idx)))

    inputs = [x2, w]
    in_specs = [x_spec, w_spec]
    if scale_output:
        inputs.append(inv_row)
        in_specs.append(pl.BlockSpec((1, TN), lambda *idx: (0, gj(*idx))))

    scratch_shapes = []
    if k_tiled:
        scratch_shapes.append(pltpu.VMEM((TR, TN), jnp.float32))

    dims = ("parallel", "parallel") + (("arbitrary",) if k_tiled else ())

    cost = pl.CostEstimate(
        flops=2 * M * K * N,
        transcendentals=0,
        bytes_accessed=M * K * xb + K * N * wb + M * N * ob)

    out2 = pl.pallas_call(
        _make_kernel(transpose, scale_output, k_tiled),
        out_shape=jax.ShapeDtypeStruct((Mp, Np), out_dtype),
        grid_spec=pltpu.PrefetchScalarGridSpec(
            num_scalar_prefetch=0,
            grid=grid,
            in_specs=in_specs,
            out_specs=out_spec,
            scratch_shapes=scratch_shapes),
        compiler_params=pltpu.CompilerParams(
            dimension_semantics=dims,
            vmem_limit_bytes=vmem_limit),
        cost_estimate=cost,
    )(*inputs)

    out = out2 if (Mp == M and Np == N) else out2[:M, :N]
    return out.reshape(*lead, N)


def _reference(x, tensor, transpose, normalize):
    t = tensor
    if normalize:
        n = jnp.sqrt(jnp.sum(jnp.square(t.astype(jnp.float32)),
                             axis=-1, keepdims=True))
        t = (t.astype(jnp.float32) / jnp.maximum(n, _NORM_EPS)).astype(t.dtype)
    if transpose:
        t = t.T
    return jnp.matmul(x, t)


if __name__ == "__main__":
    key = jax.random.PRNGKey(0)
    k1, k2, k3, k4, k5, k6, k7, k8 = jax.random.split(key, 8)

    B, S, D = 2, 8, 32

    # (1) plain x @ W (f32); output dim 48 exercises lane padding to 128.
    x1 = jax.random.normal(k1, (B, S, D), dtype=jnp.float32)
    w1 = jax.random.normal(k2, (D, 48), dtype=jnp.float32) / math.sqrt(D)

    # (2) normalize=True, transpose=False (norm folded into the weight in the wrapper).
    # (3) cosine-similarity head: bf16, x @ normalize(E, dim=-1).T with E (N, D);
    #     inverse norms applied to the output tile in-kernel (lane-dense (1, N) f32).
    x3 = jax.random.normal(k3, (B, S, D), dtype=jnp.bfloat16)
    e3 = jax.random.normal(k4, (64, D), dtype=jnp.bfloat16)

    # (4) forced K-reduction grid axis (f32 accumulator scratch), f32 inputs.
    Kbig = 256
    x4 = jax.random.normal(k5, (B, S, Kbig), dtype=jnp.float32)
    w4 = jax.random.normal(k6, (Kbig, 144), dtype=jnp.float32) / math.sqrt(Kbig)

    # (5) forced K-reduction + transpose + normalize, bf16.
    x5 = jax.random.normal(k7, (B, S, Kbig), dtype=jnp.bfloat16)
    e5 = jax.random.normal(k8, (192, Kbig), dtype=jnp.bfloat16)

    configs = [
        (x1, w1, False, False, None, 1e-2, 1e-2),
        (x1, w1, False, True, None, 1e-2, 1e-2),
        (x3, e3, True, True, None, 3e-2, 3e-2),
        (x4, w4, False, False, 128, 2e-2, 2e-2),
        (x5, e5, True, True, 128, 5e-2, 5e-2),
    ]

    for idx, (x, t, tr, nm, ktile, atol, rtol) in enumerate(configs):
        out = matrix_multiply(x, t, transpose=tr, normalize=nm, force_k_tile=ktile)
        out = jax.block_until_ready(out)
        ref = _reference(x, t, tr, nm)
        assert out.shape == ref.shape, (idx, out.shape, ref.shape)
        ok = jnp.allclose(out.astype(jnp.float32), ref.astype(jnp.float32),
                          atol=atol, rtol=rtol)
        assert ok, f"config {idx}: mismatch vs reference"

    print("KERNEL_OK")
</pallas_src>

<mosaic_0001>
module attributes {stable_mosaic.version = 11 : i64} {
  func.func @kernel(%arg0: i32, %arg1: i32, %arg2: memref<16x32xf32, #tpu.memory_space<vmem>>, %arg3: memref<32x128xf32, #tpu.memory_space<vmem>>, %arg4: memref<16x128xf32, #tpu.memory_space<vmem>>) attributes {dimension_semantics = [#tpu.dimension_semantics<parallel>, #tpu.dimension_semantics<parallel>], iteration_bounds = array<i64: 1, 1>, scalar_prefetch = 0 : i64, scratch_operands = 0 : i64, tpu.core_type = #tpu.core_type<tc>, window_params = [{transform_indices = @transform_0, window_bounds = array<i64: 16, 32>}, {transform_indices = @transform_1, window_bounds = array<i64: 32, 128>}, {transform_indices = @transform_2, window_bounds = array<i64: 16, 128>}]} {
    %c0 = arith.constant 0 : index
    %c0_0 = arith.constant 0 : index
    %0 = vector.load %arg2[%c0, %c0_0] : memref<16x32xf32, #tpu.memory_space<vmem>>, vector<16x32xf32>
    %c0_1 = arith.constant 0 : index
    %c0_2 = arith.constant 0 : index
    %1 = vector.load %arg3[%c0_1, %c0_2] : memref<32x128xf32, #tpu.memory_space<vmem>>, vector<32x128xf32>
    %cst = arith.constant dense<0.000000e+00> : vector<16x128xf32>
    %2 = tpu.matmul %0, %1, %cst {dimension_numbers = #tpu.dot_dimension_numbers<[1], [0], [0], [1], [0, 0, 1, 1], [], []>} : vector<16x32xf32>, vector<32x128xf32>, vector<16x128xf32> -> vector<16x128xf32>
    %c0_3 = arith.constant 0 : index
    %c0_4 = arith.constant 0 : index
    %3 = vector.load %arg4[%c0_3, %c0_4] : memref<16x128xf32, #tpu.memory_space<vmem>>, vector<16x128xf32>
    tpu.vector_store %arg4[%c0_3, %c0_4], %2 {strides = array<i32>} : memref<16x128xf32, #tpu.memory_space<vmem>>, vector<16x128xf32>,
    return
  }
  func.func @transform_0(%arg0: i32, %arg1: i32) -> (i32, i32) {
    %c0_i32 = arith.constant 0 : i32
    %c0_i32_0 = arith.constant 0 : i32
    return %arg0, %c0_i32 : i32, i32
  }
  func.func @transform_1(%arg0: i32, %arg1: i32) -> (i32, i32) {
    %c0_i32 = arith.constant 0 : i32
    %c0_i32_0 = arith.constant 0 : i32
    return %c0_i32, %arg1 : i32, i32
  }
  func.func @transform_2(%arg0: i32, %arg1: i32) -> (i32, i32) {
    %c0_i32 = arith.constant 0 : i32
    return %arg0, %arg1 : i32, i32
  }
}

</mosaic_0001>

<bundles_post_ra>
// kernel: tpu_custom_call.1
= control target key start
LH: loop header
LB: loop body
LE: loop exit
PB: predicated region body
PF: predicated region fallthrough
CT: control target
= control target key end

     0   :  { %7 = vsyncpa [#allocation3], 0  ;;  %s229_s0 = inlined_call_operand.hbm [shape: f32[16,32], index: 0, kind: input, shape index: {}]   ;;  %s230_s1 = inlined_call_operand.hbm [shape: f32[32,128], index: 1, kind: input, shape index: {}]   ;;  %s231_s2 = inlined_call_operand.hbm [shape: f32[16,128], index: 2, kind: output, shape index: {}]  }
   0x1   :  { %8 = vsyncpa [#allocation6], 0 }
   0x2   :  { %9 = vsyncpa [#allocation4], 0  ;;  %s14_s11 = sshll.u32 %s229_s0, 4  ;;  %s191_s12 = smov [#allocation2]   ;;  %s15_s11 = int_to_ptr.hbm [resolvable:$true] %s14_s11 }
   0x3   :  { %s16_s13 = sshll.u32 %s191_s12, 4  ;;  %s27_s16 = sshll.u32 %s230_s1, 4  ;;  %s17_s13 = int_to_ptr.vmem [resolvable:$true] %s16_s13  ;;  %s28_s16 = int_to_ptr.hbm [resolvable:$true] %s27_s16 }
   0x4   :  { %s192_s17 = smov 128   ;;  %s193_s18 = smov 8  }
   0x5   :  { %22 = dma.hbm_to_vmem [thread:$0]  %s15_s11, 256, %s17_s13, [#allocation3], %s192_s17, %s192_s17, %s193_s18  }
   0x6   :  { %s194_s19 = smov [#allocation5]  }
   0x7   :  { %s29_s20 = sshll.u32 %s194_s19, 4  ;;  %s30_s20 = int_to_ptr.vmem [resolvable:$true] %s29_s20 }
   0x8   :  { %35 = dma.hbm_to_vmem [thread:$0]  %s28_s16, 512, %s30_s20, [#allocation6], %s192_s17, %s192_s17, %s193_s18  }
   0x9   :  { %185 = dma.done.wait [#allocation3], 256  }
   0xa   :  { %186 = vsyncadd [#allocation3], 4294967040 }
   0xb   :  { %187 = dma.done.wait [#allocation6], 512  }
   0xc   :  { %188 = vsyncadd [#allocation6], 4294966784  ;;  %v49_v0 = vld [vmem:[#allocation5 + $0x18] sm:$0xff]  ;;  %v48_v1 = vld [vmem:[#allocation5 + $0x10] sm:$0xff]  ;;  %vm50_vm0 = vcmask 261120   ;;  %s195_s0 = smov [#allocation7]  }
   0xd   :  { %69 = vmatpush.msra.mxu0 %v49_v0  ;;  %104 = vmatpush.msra.mxu1 %v49_v0  ;;  %v47_v2 = vld [vmem:[#allocation5 + $0x8] sm:$0xff]  ;;  %v46_v3 = vld [vmem:[#allocation5] sm:$0xff]  ;;  %v44_v4 = vld [vmem:[#allocation2] sm:$0xff]  ;;  %s86_s1 = sshll.u32 %s195_s0, 4  ;;  %s88_s23 = sshll.u32 %s231_s2, 4  ;;  %s87_s1 = int_to_ptr.vmem [resolvable:$true] %s86_s1  ;;  %s89_s23 = int_to_ptr.hbm [resolvable:$true] %s88_s23 }
   0xe   :  { %v45_v5 = vld [vmem:[#allocation2 + $0x8] sm:$0xff] }
   0xf   :  { %70 = vmatpush.msra.mxu0 %v48_v1  ;;  %105 = vmatpush.msra.mxu1 %v48_v1 }
  0x11   :  { %71 = vmatpush.msra.mxu0 %v47_v2  ;;  %106 = vmatpush.msra.mxu1 %v47_v2 }
  0x13   :  { %72 = vmatpush.msra.mxu0 %v46_v3  ;;  %107 = vmatpush.msra.mxu1 %v46_v3 }
  0x14   :  { %102 = vmatmul.msk.f32.vlgmr.msra.gmra.mxu0 %vm50_vm0, %v44_v4  ;;  %103 = vmatmul.msk.f32.vlgmr.msra.gmra.mxu1 %vm50_vm0, %v45_v5 }
  0x91   :  { %v74_v6 = vpop.f32.mrf.mxu0  ;;  %v77_v7 = vpop.f32.mrf.mxu1 }
  0x92   :  { %80 = vst [vmem:[#allocation7] sm:$0xff] %v74_v6 }
  0x93   :  { %81 = vst [vmem:[#allocation7 + $0x8] sm:$0xff] %v77_v7 }
  0x94   :  { %94 = dma.vmem_to_hbm [thread:$0]  %s87_s1, 256, %s89_s23, [#allocation4], %s192_s17, %s192_s17, %s193_s18  }
  0x95   :  { %189 = dma.done.wait [#allocation4], 256  }
  0x96   :  { %190 = vsyncadd [#allocation4], 4294967040 }
  0x97   :  { %99 = vsyncpa [#allocation3], 1 }
  0x98   :  { %100 = vsyncpa [#allocation6], 1 }
  0x99   :  { %101 = vsyncpa [#allocation4], 1 }

</bundles_post_ra>
